<compile_context>
chip_gen: v7x
topology: tpu7x:2x2x1
jax: 0.10.0
libtpu: 0.0.40
codegen_flags: <defaults>
</compile_context>

<pallas_src>
import jax
import jax.numpy as jnp
from jax.experimental import pallas as pl
from jax.experimental.pallas import tpu as pltpu


def mlp_kernel(x_ref, w1_ref, b1_ref, w2_ref, b2_ref, o_ref):
    # x_ref:  (Nb, C_in, ts)   activation tile, pixels on the lane axis
    # w1_ref: (hidden, C_in)   fc1 weight in PyTorch conv (out, in) form, resident
    # b1_ref: (hidden, 1)
    # w2_ref: (C_out, hidden)  fc2 weight, resident
    # b2_ref: (C_out, 1)
    # o_ref:  (Nb, C_out, ts)
    w1 = w1_ref[...]
    b1 = b1_ref[...]
    w2 = w2_ref[...]
    b2 = b2_ref[...]

    nb = x_ref.shape[0]            # small static int -> fully unrolled loop
    for b in range(nb):
        x = x_ref[b]                                                   # (C_in, ts)

        # fc1: (hidden, C_in) @ (C_in, ts) -> (hidden, ts), f32 accumulation.
        h = jnp.dot(w1, x, preferred_element_type=jnp.float32)
        h = h + b1                                                     # lane broadcast
        h = jnp.clip(h, 0.0, 6.0)                                      # ReLU6
        # Dropout(p=0.0) -> identity.

        # fc2: cast h to the weight dtype (no-op for f32; native MXU for bf16).
        h = h.astype(w2.dtype)
        out = jnp.dot(w2, h, preferred_element_type=jnp.float32)       # (C_out, ts)
        out = out + b2

        o_ref[b] = out.astype(o_ref.dtype)


def _vmem_limit_bytes():
    """Generation-aware scoped-VMEM budget."""
    vmem_cap = None
    try:
        info = pltpu.get_tpu_info()
        vmem_cap = getattr(info, "vmem_capacity_bytes", None)
    except Exception:
        vmem_cap = None
    if not vmem_cap:
        vmem_cap = 64 * 1024 * 1024            # conservative (v7x per-TC size)
    # ~3/4 of physical, capped at 96 MiB (v5e/v6e: 128 MiB physical), and never
    # below the 32 MiB scoped default.
    return max(32 * 1024 * 1024, min(int(vmem_cap) * 3 // 4, 96 * 1024 * 1024))


def _target_step_bytes(vmem_limit):
    """HBM bytes to aim for per grid step (amortizes the ~0.35 us step cost)."""
    # Small VMEM budget => likely v7x (3.2 TB/s HBM) => bigger steps pay off.
    return 4 * 1024 * 1024 if vmem_limit <= 48 * 1024 * 1024 else 2 * 1024 * 1024


def _pick_spatial_tile(hw, max_ts):
    """Lane-dense spatial tile.

    Preference order: full extent (always a legal block, no masked tail even
    when HW % 128 != 0) -> largest multiple of 128 that divides HW and fits
    -> largest multiple of 128 that fits (masked tail tile, still correct
    because the op is strictly per-pixel)."""
    if hw <= 128 or hw <= max_ts:
        return hw
    t = max(128, (max_ts // 128) * 128)
    for cand in range(t, 0, -128):
        if hw % cand == 0:
            return cand
    return t


def _choose_tiling(N, C_in, C_out, hidden, HW, db, vmem_limit, target_step_bytes):
    """Pick (batch-block Nb, spatial tile ts) from bytes-per-step and VMEM."""
    # Resident weights/biases (double-buffered by the pipeline).
    weights_vmem = 2 * (hidden * C_in + C_out * hidden + hidden + C_out) * db
    budget = max(int(vmem_limit * 0.7) - weights_vmem, 256 * 1024)
    # Per-pixel VMEM per batch row: double-buffered in/out tiles + f32 hidden
    # slab + f32 output temp.
    vmem_per_px = 2 * C_in * db + 2 * C_out * db + (hidden + C_out) * 4

    ts_max = max(128, budget // vmem_per_px)
    ts = _pick_spatial_tile(HW, ts_max)
    n_sp = -(-HW // ts)

    # Batch blocking only helps once the spatial axis is already one
    # full-extent tile; then stack batch rows to reach the bytes-per-step
    # target.  Cap so the grid keeps >= 2 steps (v7x megacore) and the unroll
    # stays small.
    nb = 1
    if n_sp == 1 and N > 1:
        io_per_row = ts * (C_in + C_out) * db
        vmem_per_row = ts * vmem_per_px
        nb_cap = min(max(1, N // 2), 8)
        for cand in range(1, nb_cap + 1):
            if N % cand != 0:
                continue
            if cand * vmem_per_row > budget:
                break
            nb = cand
            if cand * io_per_row >= target_step_bytes:
                break
    return nb, ts


def mlp_pallas(x_nchw, w1, b1, w2, b2):
    """x_nchw: (N, C_in, H, W); w1: (hidden, C_in); b1: (hidden,);
       w2: (C_out, hidden); b2: (C_out,).  Returns (N, C_out, H, W)."""
    N, C_in, H, W = x_nchw.shape
    hidden = w1.shape[0]
    C_out = w2.shape[0]
    HW = H * W
    db = x_nchw.dtype.itemsize

    # Free (contiguous) reshape: NCHW -> (N, C_in, H*W).  No HBM transpose.
    x3 = x_nchw.reshape(N, C_in, HW)

    vmem_limit = _vmem_limit_bytes()
    nb, ts = _choose_tiling(N, C_in, C_out, hidden, HW, db,
                            vmem_limit, _target_step_bytes(vmem_limit))
    grid = (N // nb, -(-HW // ts))     # nb divides N; spatial tail (if any) masked

    b1_2d = b1.reshape(hidden, 1)
    b2_2d = b2.reshape(C_out, 1)

    out3 = pl.pallas_call(
        mlp_kernel,
        out_shape=jax.ShapeDtypeStruct((N, C_out, HW), x_nchw.dtype),
        grid_spec=pltpu.PrefetchScalarGridSpec(
            num_scalar_prefetch=0,
            grid=grid,
            in_specs=[
                # Activation tile: the only per-step HBM traffic.
                pl.BlockSpec((nb, C_in, ts), lambda n, s: (n, 0, s)),
                # Weights / biases: constant index_map -> fetched once, resident.
                pl.BlockSpec((hidden, C_in), lambda n, s: (0, 0)),
                pl.BlockSpec((hidden, 1), lambda n, s: (0, 0)),
                pl.BlockSpec((C_out, hidden), lambda n, s: (0, 0)),
                pl.BlockSpec((C_out, 1), lambda n, s: (0, 0)),
            ],
            out_specs=pl.BlockSpec((nb, C_out, ts), lambda n, s: (n, 0, s)),
        ),
        compiler_params=pltpu.CompilerParams(
            dimension_semantics=("parallel", "parallel"),
            vmem_limit_bytes=vmem_limit,
        ),
    )(x3, w1, b1_2d, w2, b2_2d)

    # Free reshape back to NCHW.
    return out3.reshape(N, C_out, H, W)


def mlp_reference(x_nchw, w1, b1, w2, b2):
    # Pure-JAX reference: fc1 -> relu6 -> fc2 (1x1 convs == channel matmuls),
    # weights in PyTorch conv (out, in) form.
    h = jnp.einsum("nchw,dc->ndhw", x_nchw, w1) + b1[None, :, None, None]
    h = jnp.clip(h, 0.0, 6.0)
    o = jnp.einsum("ndhw,od->nohw", h, w2) + b2[None, :, None, None]
    return o


if __name__ == "__main__":
    key = jax.random.PRNGKey(0)
    N, C_in, Hs, Ws = 2, 4, 16, 16          # batch=2, channels=4, spatial=16
    hidden = 8
    C_out = C_in                             # out_features defaults to in_features

    kx, kw1, kb1, kw2, kb2 = jax.random.split(key, 5)
    x = jax.random.normal(kx, (N, C_in, Hs, Ws), dtype=jnp.float32)

    # Deterministic Conv2d-style init (uniform in +/- 1/sqrt(fan_in)),
    # weights in PyTorch conv layout (out_channels, in_channels).
    lim1 = 1.0 / (C_in ** 0.5)
    w1 = jax.random.uniform(kw1, (hidden, C_in), jnp.float32, -lim1, lim1)
    b1 = jax.random.uniform(kb1, (hidden,), jnp.float32, -lim1, lim1)
    lim2 = 1.0 / (hidden ** 0.5)
    w2 = jax.random.uniform(kw2, (C_out, hidden), jnp.float32, -lim2, lim2)
    b2 = jax.random.uniform(kb2, (C_out,), jnp.float32, -lim2, lim2)

    out = mlp_pallas(x, w1, b1, w2, b2)
    out = jax.block_until_ready(out)

    ref = mlp_reference(x, w1, b1, w2, b2)
    assert out.shape == (N, C_out, Hs, Ws)
    assert jnp.allclose(out, ref, atol=1e-5, rtol=1e-5), "mismatch vs reference"

    print("KERNEL_OK")
</pallas_src>

<mosaic_0001>
module attributes {stable_mosaic.version = 11 : i64} {
  func.func @mlp_kernel(%arg0: i32, %arg1: i32, %arg2: memref<1x4x256xf32, #tpu.memory_space<vmem>>, %arg3: memref<8x4xf32, #tpu.memory_space<vmem>>, %arg4: memref<8x1xf32, #tpu.memory_space<vmem>>, %arg5: memref<4x8xf32, #tpu.memory_space<vmem>>, %arg6: memref<4x1xf32, #tpu.memory_space<vmem>>, %arg7: memref<1x4x256xf32, #tpu.memory_space<vmem>>) attributes {dimension_semantics = [#tpu.dimension_semantics<parallel>, #tpu.dimension_semantics<parallel>], iteration_bounds = array<i64: 2, 1>, scalar_prefetch = 0 : i64, scratch_operands = 0 : i64, tpu.core_type = #tpu.core_type<tc>, window_params = [{transform_indices = @transform_0, window_bounds = array<i64: 1, 4, 256>}, {pipeline_mode = #tpu.pipeline_mode<synchronous>, transform_indices = @transform_1, window_bounds = array<i64: 8, 4>}, {pipeline_mode = #tpu.pipeline_mode<synchronous>, transform_indices = @transform_2, window_bounds = array<i64: 8, 1>}, {pipeline_mode = #tpu.pipeline_mode<synchronous>, transform_indices = @transform_3, window_bounds = array<i64: 4, 8>}, {pipeline_mode = #tpu.pipeline_mode<synchronous>, transform_indices = @transform_4, window_bounds = array<i64: 4, 1>}, {transform_indices = @transform_5, window_bounds = array<i64: 1, 4, 256>}]} {
    %c0 = arith.constant 0 : index
    %c0_0 = arith.constant 0 : index
    %0 = vector.load %arg3[%c0, %c0_0] : memref<8x4xf32, #tpu.memory_space<vmem>>, vector<8x4xf32>
    %c0_1 = arith.constant 0 : index
    %c0_2 = arith.constant 0 : index
    %1 = vector.load %arg4[%c0_1, %c0_2] : memref<8x1xf32, #tpu.memory_space<vmem>>, vector<8x1xf32>
    %c0_3 = arith.constant 0 : index
    %c0_4 = arith.constant 0 : index
    %2 = vector.load %arg5[%c0_3, %c0_4] : memref<4x8xf32, #tpu.memory_space<vmem>>, vector<4x8xf32>
    %c0_5 = arith.constant 0 : index
    %c0_6 = arith.constant 0 : index
    %3 = vector.load %arg6[%c0_5, %c0_6] : memref<4x1xf32, #tpu.memory_space<vmem>>, vector<4x1xf32>
    %c0_7 = arith.constant 0 : index
    %c0_8 = arith.constant 0 : index
    %c0_9 = arith.constant 0 : index
    %4 = vector.load %arg2[%c0_7, %c0_8, %c0_9] : memref<1x4x256xf32, #tpu.memory_space<vmem>>, vector<1x4x256xf32>
    %5 = vector.shape_cast %4 : vector<1x4x256xf32> to vector<4x256xf32>
    %cst = arith.constant dense<0.000000e+00> : vector<8x256xf32>
    %6 = tpu.matmul %0, %5, %cst {dimension_numbers = #tpu.dot_dimension_numbers<[1], [0], [0], [1], [0, 0, 1, 1], [], []>} : vector<8x4xf32>, vector<4x256xf32>, vector<8x256xf32> -> vector<8x256xf32>
    %7 = vector.broadcast %1 : vector<8x1xf32> to vector<8x256xf32>
    %8 = arith.addf %6, %7 : vector<8x256xf32>
    %cst_10 = arith.constant 0.000000e+00 : f32
    %cst_11 = arith.constant 6.000000e+00 : f32
    %9 = vector.broadcast %cst_10 : f32 to vector<8x256xf32>
    %10 = arith.maximumf %9, %8 : vector<8x256xf32>
    %11 = vector.broadcast %cst_11 : f32 to vector<8x256xf32>
    %12 = arith.minimumf %11, %10 : vector<8x256xf32>
    %cst_12 = arith.constant dense<0.000000e+00> : vector<4x256xf32>
    %13 = tpu.matmul %2, %12, %cst_12 {dimension_numbers = #tpu.dot_dimension_numbers<[1], [0], [0], [1], [0, 0, 1, 1], [], []>} : vector<4x8xf32>, vector<8x256xf32>, vector<4x256xf32> -> vector<4x256xf32>
    %14 = vector.broadcast %3 : vector<4x1xf32> to vector<4x256xf32>
    %15 = arith.addf %13, %14 : vector<4x256xf32>
    %c0_13 = arith.constant 0 : index
    %c0_14 = arith.constant 0 : index
    %c0_15 = arith.constant 0 : index
    %16 = vector.load %arg7[%c0_13, %c0_14, %c0_15] : memref<1x4x256xf32, #tpu.memory_space<vmem>>, vector<1x4x256xf32>
    %17 = vector.shape_cast %16 : vector<1x4x256xf32> to vector<4x256xf32>
    %18 = vector.shape_cast %15 : vector<4x256xf32> to vector<1x4x256xf32>
    tpu.vector_store %arg7[%c0_13, %c0_14, %c0_15], %18 {strides = array<i32>} : memref<1x4x256xf32, #tpu.memory_space<vmem>>, vector<1x4x256xf32>,
    return
  }
  func.func @transform_0(%arg0: i32, %arg1: i32) -> (i32, i32, i32) {
    %c0_i32 = arith.constant 0 : i32
    %c0_i32_0 = arith.constant 0 : i32
    return %arg0, %c0_i32, %arg1 : i32, i32, i32
  }
  func.func @transform_1(%arg0: i32, %arg1: i32) -> (i32, i32) {
    %c0_i32 = arith.constant 0 : i32
    %c0_i32_0 = arith.constant 0 : i32
    %c0_i32_1 = arith.constant 0 : i32
    return %c0_i32, %c0_i32_0 : i32, i32
  }
  func.func @transform_2(%arg0: i32, %arg1: i32) -> (i32, i32) {
    %c0_i32 = arith.constant 0 : i32
    %c0_i32_0 = arith.constant 0 : i32
    %c0_i32_1 = arith.constant 0 : i32
    return %c0_i32, %c0_i32_0 : i32, i32
  }
  func.func @transform_3(%arg0: i32, %arg1: i32) -> (i32, i32) {
    %c0_i32 = arith.constant 0 : i32
    %c0_i32_0 = arith.constant 0 : i32
    %c0_i32_1 = arith.constant 0 : i32
    return %c0_i32, %c0_i32_0 : i32, i32
  }
  func.func @transform_4(%arg0: i32, %arg1: i32) -> (i32, i32) {
    %c0_i32 = arith.constant 0 : i32
    %c0_i32_0 = arith.constant 0 : i32
    %c0_i32_1 = arith.constant 0 : i32
    return %c0_i32, %c0_i32_0 : i32, i32
  }
  func.func @transform_5(%arg0: i32, %arg1: i32) -> (i32, i32, i32) {
    %c0_i32 = arith.constant 0 : i32
    %c0_i32_0 = arith.constant 0 : i32
    return %arg0, %c0_i32, %arg1 : i32, i32, i32
  }
}

</mosaic_0001>

<bundles_post_ra>
// kernel: tpu_custom_call.1
= control target key start
LH: loop header
LB: loop body
LE: loop exit
PB: predicated region body
PF: predicated region fallthrough
CT: control target
= control target key end

     0   :  { %10 = vsyncpa [#allocation3], 0  ;;  %s843_s0 = inlined_call_operand.vmem [shape: f32[2,4,256], index: 0, kind: input, shape index: {}]   ;;  %s844_s1 = inlined_call_operand.vmem [shape: f32[8,4], index: 1, kind: input, shape index: {}]   ;;  %s845_s2 = inlined_call_operand.vmem [shape: f32[8,1], index: 2, kind: input, shape index: {}]   ;;  %s846_s3 = inlined_call_operand.vmem [shape: f32[4,8], index: 3, kind: input, shape index: {}]   ;;  %s847_s4 = inlined_call_operand.vmem [shape: f32[4,1], index: 4, kind: input, shape index: {}]   ;;  %s848_s5 = inlined_call_operand.hbm [shape: f32[2,4,256], index: 5, kind: output, shape index: {}]  }
   0x1   :  { %12 = vsyncpa [#allocation3 + $0x1], 0  ;;  %s719_s18 = smov 0   ;;  %s721_s19 = smov 0  }
   0x2   :  { %s723_s20 = smov 0   ;;  %s725_s21 = smov 0  }
   0x3   :  { %s727_s22 = smov 0   ;;  %s729_s23 = smov 0  }
   0x4 LB: > { %s528_s24 = sadd.s32 4294967295, %s684_s23   ;;  %s529_s25 = sadd.s32 4294967294, %s684_s23   ;;  %s684_s23 = sphi %s729_s23, %s18_s23   ;;  %s680_s22 = sphi %s727_s22, %s855_s22   ;;  %s676_s21 = sphi %s725_s21, %s854_s21   ;;  %s672_s20 = sphi %s723_s20, %s853_s20   ;;  %s668_s19 = sphi %s721_s19, %s852_s19   ;;  %s664_s18 = sphi %s719_s18, %s851_s18  }
   0x5   : > { %s30_s26 = sadd.s32 1, %s680_s22  ;;  %s151_s27 = sadd.s32 1, %s672_s20 }
   0x6   : > { %p32_p0 = scmp.ge.s32.totalorder %s30_s26, 2  ;;  %p161_p1 = scmp.ne.s32.totalorder %s672_s20, %s668_s19 }
   0x7   : > { %p162_p2 = scmp.eq.s32.totalorder %s528_s24, 1  ;;  %p167_p3 = scmp.ne.s32.totalorder %s668_s19, %s664_s18 }
   0x8   : > { %s857_s26 = smov (%p32_p0, %s30_s26), 0  ;;  %p168_p5 = scmp.eq.s32.totalorder %s529_s25, 1 }
   0x9   : > { %p759_p4 = por %p162_p2, %p161_p1  ;;  %s146_s29 = ssub.s32 %s680_s22, %s857_s26 }
   0xa   : > { %p532_p6 = scmp.ge.s32.totalorder %s684_s23, 1  ;;  %p149_p7 = scmp.eq.s32.totalorder %s146_s29, 0 }
   0xb   : > { %p766_p8 = por %p168_p5, %p167_p3  ;;  %p211_p9 = scmp.lt.s32.totalorder %s684_s23, 3 }
   0xc   : > { %s772_s6 = scalar_select %p149_p7, %s672_s20, %s151_s27  }
   0xd   : > { %p212_p10 = pnand %p532_p6, %p211_p9 }
   0xe   : > { %p244_p11 = scmp.lt.s32.totalorder (!%p212_p10), %s676_s21, 1  ;;  %v686_v0 = vmov (!%p212_p10), 0.0   ;;  %v687_v1 = vmov (!%p212_p10), 0   ;;  %v255_v2 = vld [vmem:[%s845_s2] sm:$0xff] (!%p212_p10)  ;;  %vm270_vm0 = vcmask (!%p212_p10), 1043456   ;;  %vm266_vm1 = vcmask (!%p212_p10), 31744  }
   0xf   : > { %215 = sbr.rel (%p212_p10) target bundleno = 483 (0x1e3), region = 40  ;;  %339 = vmatprep.mubr.f32.mxu0 (!%p212_p10), %v686_v0  ;;  %604 = vset.pattern.permute.xlu0 (!%p212_p10), %v687_v1  ;;  %v257_v3 = vld [vmem:[%s847_s4] sm:$0xf] (!%p212_p10)  ;;  %vm355_vm2 = vcmask (!%p212_p10), 64512   ;;  %s240_s27 = sand.u32 (!%p212_p10), 1, %s668_s19  }
  0x10   : > { %261 = vperm.xlu0 (!%p212_p10), %604, %v255_v2   ;;  %423 = vmatprep.mubr.f32.mxu1 (!%p212_p10), %v686_v0  ;;  %v254_v6 = vld [vmem:[%s844_s1] sm:$0xff] (!%p212_p10)  ;;  %s533_s29 = sshll.u32 (!%p212_p10), %s240_s27, 3  ;;  %s546_s7 = sshll.u32 (!%p212_p10), %s676_s21, 7 }
  0x11   : > { %v256_v16 = vld [vmem:[%s846_s3] sm:$0xf] (!%p212_p10)  ;;  %s242_s8 = scalar_lea.vmem (!%p212_p10), [#allocation2], %s533_s29  ;;  %s436_s13 = scalar_lea.sflag (!%p212_p10), [#allocation3], %s240_s27 }
  0x14   : > { %352 = vperm.xlu0 (!%p212_p10), %604, %v257_v3  }
  0x16   : > { %s245_s9 = scalar_select %p244_p11, %s676_s21, 1 }
  0x17   : > { %s688_s21 = smov [#allocation2]  }
  0x18   : > { %s545_s12 = sshll.u32 %s245_s9, 3  ;;  %s452_s9 = sshll.u32 %s242_s8, 4  ;;  %s798_s9 = int_to_ptr.vmem [resolvable:$true] %s452_s9 }
  0x19   : > { %s251_s15 = scalar_lea.vmem %s843_s0, %s545_s12  ;;  %s796_s12 = scalar_lea.hbm %s848_s5, %s546_s7 }
  0x1a   : > { %v258_v4 = vld [vmem:[%s251_s15] sm:$0xff]  ;;  %s606_s14 = scalar_lea.vmem %s798_s9, 128  ;;  %s610_s15 = sshll.u32 %s688_s21, 4  ;;  %s611_s15 = int_to_ptr.vmem [resolvable:$false] %s610_s15 }
  0x1b   : > { %v265_v5 = vcombine.high %v258_v4, %v258_v4  ;;  %p607_p12 = scmp.ne.s32.totalorder %s798_s9, %s606_s14  ;;  %s612_s16 = scalar_lea.vmem %s611_s15, 256 }
  0x1c   : > { %p613_p1 = scmp.lt.s32.totalorder %s798_s9, %s611_s15  ;;  %p614_p2 = scmp.lt.s32.totalorder %s612_s16, %s606_s14 }
  0x1d   : > { %536 = vmatprep.subr.msk.mxu0 %vm270_vm0, %v265_v5  ;;  %p608_p13 = pnand %p607_p12, %p759_p4 }
  0x1e   : > { %537 = vmatpush1.msk.msra.mxu0 %vm270_vm0, %v258_v4  ;;  %p615_p3 = por %p614_p2, %p613_p1 }
  0x1f   : > { %538 = vmatmul.mubr.msk.f32.vlgmr.msra.gmra.mrb[0].mxu0 %vm266_vm1, %v254_v6  ;;  %p609_p0 = pneg %p608_p13 }
  0x21   : > { %p616_p5 = pnand %p615_p3, %p609_p0 }
  0x8f   : > { %v262_v7 = vpop.permute.xlu0 %261 }
  0x93   : > { %v353_v17 = vpop.permute.xlu0 %352 }
  0xf2   : > { %v341_v8 = vpop.f32.mrb[0].mxu0 }
  0xf3   : > { %v342_v9 = vadd.f32 %v341_v8, %v262_v7  ;;  %v343_v10 = vpop.f32.mrb[1].mxu0 }
  0xf4   : > { %v344_v11 = vadd.f32 %v343_v10, %v262_v7 }
  0xf5   : > { %v346_v12 = vmax.f32 %v342_v9, 0.0 }
  0xf6   : > { %v347_v13 = vmax.f32 %v344_v11, 0.0 }
  0xf7   : > { %v348_v15 = vmin.f32 %v346_v12, 6.0 }
  0xf8   : > { %v349_v14 = vmin.f32 %v347_v13, 6.0 }
  0xfa   : > { %359 = vmatprep.subr.mxu1 %v349_v14 }
  0xfb   : > { %360 = vmatpush1.msra.mxu1 %v348_v15 }
  0xfc   : > { %539 = vmatmul.mubr.msk.f32.vlgmr.msra.gmra.mrb[0].mxu1 %vm355_vm2, %v256_v16 }
 0x1cf   : > { %v425_v18 = vpop.f32.mrb[0].mxu1 }
 0x1d0   : > { %v426_v19 = vadd.f32 %v425_v18, %v353_v17  ;;  %v427_v20 = vpop.f32.mrb[1].mxu1 }
 0x1d1   : > { %v428_v21 = vadd.f32 %v427_v20, %v353_v17 }
 0x1d3   : > { %v432_v22 = vcombine.low %v426_v19, %v428_v21 }
 0x1d5   : > { %434 = vst [vmem:[%s242_s8] sm:$0xff] %v432_v22 }
 0x1d6   : > { %619 = shalt.err (!%p616_p5)
}
 0x1d7   : > { %s620_s17 = scalar_lea.hbm %s796_s12, 128  ;;  %s624_s27 = scalar_lea.hbm %s848_s5, 256 }
 0x1d8   : > { %p621_p6 = scmp.ne.s32.totalorder %s796_s12, %s620_s17  ;;  %p625_p10 = scmp.lt.u32.totalorder %s796_s12, %s848_s5 }
 0x1d9   : > { %p626_p11 = scmp.lt.u32.totalorder %s624_s27, %s620_s17  ;;  %p628_p13 = scmp.lt.u32.totalorder %s620_s17, %s796_s12 }
 0x1da   : > { %p622_p7 = pnand %p621_p6, %p759_p4 }
 0x1db   : > { %p627_p12 = por %p626_p11, %p625_p10 }
 0x1dc   : > { %p623_p9 = pneg %p622_p7 }
 0x1dd   : > { %p629_p0 = por %p628_p13, %p627_p12 }
 0x1df   : > { %p630_p1 = pnand %p629_p0, %p623_p9 }
 0x1e1   : > { %633 = shalt.err (!%p630_p1)
}
 0x1e2   : > { %547 = dma.vmem_to_hbm [thread:$0]  (%p759_p4), %s798_s9, 128, %s796_s12, %s436_s13  }
 0x1e3 PF: > { %p553_p2 = scmp.ge.s32.totalorder %s684_s23, 2  ;;  %s464_s8 = sand.u32 1, %s664_s18  }
 0x1e4   : > { %s465_s10 = scalar_lea.sflag [#allocation3], %s464_s8 }
 0x1e5   : > { %p550_p3 = pnand %p553_p2, %p766_p8 }
 0x1e7   : > { %659 = dma.done.wait (!%p550_p3), %s465_s10, 128  }
 0x1e8   : > { %661 = vsyncadd (!%p550_p3), %s465_s10, 4294967168  ;;  %s18_s23 = sadd.s32 1, %s684_s23   ;;  %s851_s18 = smov %s668_s19 }
 0x1e9   : > { %p15_p5 = scmp.ge.s32.totalorder %s18_s23, 4   ;;  %s852_s19 = smov %s672_s20 }
 0x1ea   : > { %s853_s20 = smov %s772_s6  ;;  %s854_s21 = smov %s680_s22 }
 0x1eb   : > { %s855_s22 = smov %s857_s26  ;;  %17 = sbr.rel (!%p15_p5) target bundleno = 4 (0x4), region = 75 }
 0x1f2   :  { %470 = vsyncpa [#allocation3], 1 }
 0x1f3   :  { %472 = vsyncpa [#allocation3 + $0x1], 1 }

</bundles_post_ra>
